<compile_context>
chip_gen: v5e
topology: v5e:2x2
jax: 0.10.0
libtpu: 0.0.40
codegen_flags: <defaults>
</compile_context>

<pallas_src>
import jax
import jax.numpy as jnp
from jax.experimental import pallas as pl
from jax.experimental.pallas import tpu as pltpu


IN_FEATURES = 784
H1 = 150
H2 = 20

ALIGN = 16          # sublane alignment (covers bf16 (16,128) tiling too)
MAX_TILE_B = 8192   # review's upper recommendation (v6e)
_SLACK_BYTES = 8 << 20


def _round_up(n, m):
    return (n + m - 1) // m * m


def _cdiv(a, b):
    return (a + b - 1) // b


def _vmem_budget_bytes():
    """Generation-aware scoped-VMEM budget: ~3/4 of physical, capped at 96 MiB.

    v5e/v6e report 128 MiB -> 96 MiB budget; v7x reports 64 MiB -> 48 MiB.
    Falls back to the most restrictive figure (v7x) if the query fails.
    """
    try:
        phys = int(pltpu.get_tpu_info().vmem_capacity_bytes)
    except Exception:
        phys = 64 << 20
    return int(min(phys * 3 // 4, 96 << 20))


def _discriminator_kernel(x_ref, w1_ref, b1_ref, w2_ref, b2_ref, w3_ref,
                          b3_ref, out_ref):
    # fc1: bf16 MXU matmul, f32 accumulation; bias + ReLU in f32.
    x = x_ref[...].astype(jnp.bfloat16)                            # (TB, 784)
    h1 = jnp.dot(x, w1_ref[...], preferred_element_type=jnp.float32)
    h1 = jnp.maximum(h1 + b1_ref[...], 0.0)                        # (TB, 150)

    # fc2: bf16 MXU matmul, f32 accumulation.
    h2 = jnp.dot(h1.astype(jnp.bfloat16), w2_ref[...],
                 preferred_element_type=jnp.float32)
    h2 = jnp.maximum(h2 + b2_ref[...], 0.0)                        # (TB, 20)

    # fc3 (20 -> 1): lane-broadcast multiply + lane reduce on the VPU/XLU
    # instead of a degenerate 20x1 MXU matmul. b3 is an SMEM scalar.
    logits = jnp.sum(h2 * w3_ref[...], axis=-1, keepdims=True) + b3_ref[0, 0]
    out_ref[...] = jax.nn.sigmoid(logits)                          # (TB, 1)


def discriminator_forward(x, params, tile_b=None):
    """x: (B, 1, 28, 28) or (B, 784), f32 or bf16. Returns (B, 1) f32 probs."""
    w1, b1, w2, b2, w3, b3 = params

    # Keep bf16 inputs as bf16 (halves the dominant HBM stream); anything else
    # is promoted to f32 in the wrapper (PyTorch-parity default).
    x2d = x.reshape(-1, IN_FEATURES)
    if x2d.dtype != jnp.bfloat16:
        x2d = x2d.astype(jnp.float32)
    B = x2d.shape[0]
    x_itemsize = x2d.dtype.itemsize

    # ---- Tile sizing (generation-aware) -------------------------------------
    budget = _vmem_budget_bytes()
    if tile_b is None:
        tile_b = MAX_TILE_B if budget >= (80 << 20) else 4096  # v5e/v6e : v7x

    # VMEM model: double-buffered x tile + in-kernel bf16 copy of x + h1/h2
    # (f32 + bf16) + double-buffered (tb,1) output, plus resident weights.
    weight_vmem = 2 * int(w1.size * w1.dtype.itemsize
                          + w2.size * w2.dtype.itemsize
                          + b1.size * 4 + b2.size * 4 + w3.size * 4 + 4)
    per_row = (2 * IN_FEATURES * x_itemsize   # x, double-buffered
               + IN_FEATURES * 2              # bf16 copy of the x tile
               + H1 * 6 + H2 * 6              # h1/h2 in f32 + bf16
               + 2 * 4)                       # output tile, double-buffered
    cap = (budget - weight_vmem - _SLACK_BYTES) // per_row
    cap = max(ALIGN, (cap // ALIGN) * ALIGN)
    tile_b = max(ALIGN, min(_round_up(tile_b, ALIGN), cap, MAX_TILE_B))

    # Balanced tiling: never leave a mostly-padding last tile, and keep at
    # least two grid steps (when the batch allows it) so the "parallel" axis
    # can shard across v7x's two TensorCores.
    b_aligned = _round_up(B, ALIGN)
    num_tiles = _cdiv(b_aligned, tile_b)
    if b_aligned >= 2 * ALIGN:
        num_tiles = max(num_tiles, 2)
    tb = _round_up(_cdiv(b_aligned, num_tiles), ALIGN)
    num_tiles = _cdiv(b_aligned, tb)
    B_pad = num_tiles * tb
    if B_pad != B:
        x2d = jnp.pad(x2d, ((0, B_pad - B), (0, 0)))

    vmem_limit = int(min(budget,
                         max(32 << 20,
                             weight_vmem + per_row * tb + _SLACK_BYTES)))

    # ---- Cost hint -----------------------------------------------------------
    weight_bytes = int(w1.size * w1.dtype.itemsize + w2.size * w2.dtype.itemsize
                       + b1.size * 4 + b2.size * 4 + w3.size * 4 + 4)
    cost = pl.CostEstimate(
        flops=2 * B_pad * (IN_FEATURES * H1 + H1 * H2 + H2),
        bytes_accessed=B_pad * IN_FEATURES * x_itemsize + weight_bytes
                       + B_pad * 4,
        transcendentals=B_pad,
    )

    out = pl.pallas_call(
        _discriminator_kernel,
        out_shape=jax.ShapeDtypeStruct((B_pad, 1), jnp.float32),
        grid=(num_tiles,),
        in_specs=[
            pl.BlockSpec((tb, IN_FEATURES), lambda i: (i, 0)),   # x: streamed
            pl.BlockSpec((IN_FEATURES, H1), lambda i: (0, 0)),   # w1 resident
            pl.BlockSpec((1, H1), lambda i: (0, 0)),             # b1 resident
            pl.BlockSpec((H1, H2), lambda i: (0, 0)),            # w2 resident
            pl.BlockSpec((1, H2), lambda i: (0, 0)),             # b2 resident
            pl.BlockSpec((1, H2), lambda i: (0, 0)),             # w3 row
            pl.BlockSpec(memory_space=pltpu.MemorySpace.SMEM),   # b3 scalar
        ],
        out_specs=pl.BlockSpec((tb, 1), lambda i: (i, 0)),
        compiler_params=pltpu.CompilerParams(
            dimension_semantics=("parallel",),
            vmem_limit_bytes=vmem_limit),
        cost_estimate=cost,
    )(x2d, w1, b1, w2, b2, w3, b3)
    return out[:B]


def init_params(key):
    """PyTorch nn.Linear-style init (U[-1/sqrt(in), 1/sqrt(in)]).

    fc1/fc2 weights stored as bf16 (in, out); biases as f32 (1, out);
    fc3 weight stored as an f32 (1, 20) row, fc3 bias as f32 (1, 1).
    Precision contract: fc1/fc2 weights and x are bf16-quantized for the MXU;
    all bias adds, activations, and accumulations are f32.
    """
    def linear(key, fan_in, fan_out, w_dtype):
        kw, kb = jax.random.split(key)
        bound = 1.0 / jnp.sqrt(jnp.float32(fan_in))
        w = jax.random.uniform(kw, (fan_in, fan_out), jnp.float32, -bound, bound)
        b = jax.random.uniform(kb, (1, fan_out), jnp.float32, -bound, bound)
        return w.astype(w_dtype), b

    k1, k2, k3 = jax.random.split(key, 3)
    w1, b1 = linear(k1, IN_FEATURES, H1, jnp.bfloat16)
    w2, b2 = linear(k2, H1, H2, jnp.bfloat16)
    w3, b3 = linear(k3, H2, 1, jnp.float32)
    return (w1, b1, w2, b2, w3.reshape(1, H2), b3.reshape(1, 1))


def _reference_forward(x, params):
    """Pure-JAX reference with the same bf16 weight / input quantization."""
    w1, b1, w2, b2, w3, b3 = params
    x2d = x.reshape(-1, IN_FEATURES).astype(jnp.float32)
    h1 = x2d.astype(jnp.bfloat16).astype(jnp.float32) @ w1.astype(jnp.float32)
    h1 = jnp.maximum(h1 + b1, 0.0)
    h2 = h1.astype(jnp.bfloat16).astype(jnp.float32) @ w2.astype(jnp.float32)
    h2 = jnp.maximum(h2 + b2, 0.0)
    logits = jnp.sum(h2 * w3, axis=-1, keepdims=True) + b3[0, 0]
    return jax.nn.sigmoid(logits)


if __name__ == "__main__":
    key = jax.random.PRNGKey(0)
    kp, kx = jax.random.split(key)
    params = init_params(kp)

    # Small MNIST-like batch: NCHW (B=2, 1, 28, 28) flattened to 784 inside.
    x = jax.random.normal(kx, (2, 1, 28, 28), dtype=jnp.float32)
    out = jax.block_until_ready(discriminator_forward(x, params))
    ref = _reference_forward(x, params)
    assert out.shape == (2, 1)
    assert jnp.allclose(out, ref, atol=2e-3, rtol=2e-3)

    # Multi-tile grid (>= 2 grid steps + row padding exercised).
    x2 = jax.random.normal(kx, (20, 1, 28, 28), dtype=jnp.float32)
    out2 = jax.block_until_ready(discriminator_forward(x2, params, tile_b=16))
    ref2 = _reference_forward(x2, params)
    assert out2.shape == (20, 1)
    assert jnp.allclose(out2, ref2, atol=2e-3, rtol=2e-3)

    # bf16-streamed x: halves the dominant HBM traffic when the producer
    # already emits bf16 (auto tile sizing + balanced multi-tile path).
    x3 = jax.random.normal(kx, (37, IN_FEATURES),
                           dtype=jnp.float32).astype(jnp.bfloat16)
    out3 = jax.block_until_ready(discriminator_forward(x3, params))
    ref3 = _reference_forward(x3, params)
    assert out3.shape == (37, 1)
    assert jnp.allclose(out3, ref3, atol=2e-3, rtol=2e-3)

    print("KERNEL_OK")
</pallas_src>

<mosaic_0001>
module attributes {stable_mosaic.version = 11 : i64} {
  func.func @_discriminator_kernel(%arg0: i32, %arg1: memref<16x784xf32, #tpu.memory_space<vmem>>, %arg2: memref<784x150xbf16, #tpu.memory_space<vmem>>, %arg3: memref<1x150xf32, #tpu.memory_space<vmem>>, %arg4: memref<150x20xbf16, #tpu.memory_space<vmem>>, %arg5: memref<1x20xf32, #tpu.memory_space<vmem>>, %arg6: memref<1x20xf32, #tpu.memory_space<vmem>>, %arg7: memref<1x1xf32, #tpu.memory_space<smem>>, %arg8: memref<16x1xf32, #tpu.memory_space<vmem>>) attributes {dimension_semantics = [#tpu.dimension_semantics<parallel>], iteration_bounds = array<i64: 1>, scalar_prefetch = 0 : i64, scratch_operands = 0 : i64, tpu.core_type = #tpu.core_type<tc>, window_params = [{transform_indices = @transform_0, window_bounds = array<i64: 16, 784>}, {pipeline_mode = #tpu.pipeline_mode<synchronous>, transform_indices = @transform_1, window_bounds = array<i64: 784, 150>}, {pipeline_mode = #tpu.pipeline_mode<synchronous>, transform_indices = @transform_2, window_bounds = array<i64: 1, 150>}, {pipeline_mode = #tpu.pipeline_mode<synchronous>, transform_indices = @transform_3, window_bounds = array<i64: 150, 20>}, {pipeline_mode = #tpu.pipeline_mode<synchronous>, transform_indices = @transform_4, window_bounds = array<i64: 1, 20>}, {pipeline_mode = #tpu.pipeline_mode<synchronous>, transform_indices = @transform_5, window_bounds = array<i64: 1, 20>}, {transform_indices = @transform_6, window_bounds = array<i64: 1, 1>}, {transform_indices = @transform_7, window_bounds = array<i64: 16, 1>}]} {
    %c0 = arith.constant 0 : index
    %c0_0 = arith.constant 0 : index
    %0 = vector.load %arg1[%c0, %c0_0] : memref<16x784xf32, #tpu.memory_space<vmem>>, vector<16x784xf32>
    %1 = arith.truncf %0 : vector<16x784xf32> to vector<16x784xbf16>
    %c0_1 = arith.constant 0 : index
    %c0_2 = arith.constant 0 : index
    %2 = vector.load %arg2[%c0_1, %c0_2] : memref<784x150xbf16, #tpu.memory_space<vmem>>, vector<784x150xbf16>
    %cst = arith.constant dense<0.000000e+00> : vector<16x150xf32>
    %3 = tpu.matmul %1, %2, %cst {dimension_numbers = #tpu.dot_dimension_numbers<[1], [0], [0], [1], [0, 0, 1, 1], [], []>} : vector<16x784xbf16>, vector<784x150xbf16>, vector<16x150xf32> -> vector<16x150xf32>
    %c0_3 = arith.constant 0 : index
    %c0_4 = arith.constant 0 : index
    %4 = vector.load %arg3[%c0_3, %c0_4] : memref<1x150xf32, #tpu.memory_space<vmem>>, vector<1x150xf32>
    %5 = vector.broadcast %4 : vector<1x150xf32> to vector<16x150xf32>
    %6 = arith.addf %3, %5 : vector<16x150xf32>
    %cst_5 = arith.constant 0.000000e+00 : f32
    %7 = vector.broadcast %cst_5 : f32 to vector<16x150xf32>
    %8 = arith.maximumf %6, %7 : vector<16x150xf32>
    %9 = arith.truncf %8 : vector<16x150xf32> to vector<16x150xbf16>
    %c0_6 = arith.constant 0 : index
    %c0_7 = arith.constant 0 : index
    %10 = vector.load %arg4[%c0_6, %c0_7] : memref<150x20xbf16, #tpu.memory_space<vmem>>, vector<150x20xbf16>
    %cst_8 = arith.constant dense<0.000000e+00> : vector<16x20xf32>
    %11 = tpu.matmul %9, %10, %cst_8 {dimension_numbers = #tpu.dot_dimension_numbers<[1], [0], [0], [1], [0, 0, 1, 1], [], []>} : vector<16x150xbf16>, vector<150x20xbf16>, vector<16x20xf32> -> vector<16x20xf32>
    %c0_9 = arith.constant 0 : index
    %c0_10 = arith.constant 0 : index
    %12 = vector.load %arg5[%c0_9, %c0_10] : memref<1x20xf32, #tpu.memory_space<vmem>>, vector<1x20xf32>
    %13 = vector.broadcast %12 : vector<1x20xf32> to vector<16x20xf32>
    %14 = arith.addf %11, %13 : vector<16x20xf32>
    %cst_11 = arith.constant 0.000000e+00 : f32
    %15 = vector.broadcast %cst_11 : f32 to vector<16x20xf32>
    %16 = arith.maximumf %14, %15 : vector<16x20xf32>
    %c0_12 = arith.constant 0 : index
    %c0_13 = arith.constant 0 : index
    %17 = vector.load %arg6[%c0_12, %c0_13] : memref<1x20xf32, #tpu.memory_space<vmem>>, vector<1x20xf32>
    %18 = vector.broadcast %17 : vector<1x20xf32> to vector<16x20xf32>
    %19 = arith.mulf %16, %18 : vector<16x20xf32>
    %cst_14 = arith.constant dense<0.000000e+00> : vector<16xf32>
    %20 = vector.multi_reduction <add>, %19, %cst_14 [1] : vector<16x20xf32> to vector<16xf32>
    %21 = vector.shape_cast %20 : vector<16xf32> to vector<16x1xf32>
    %c0_15 = arith.constant 0 : index
    %c0_16 = arith.constant 0 : index
    %22 = memref.load %arg7[%c0_15, %c0_16] : memref<1x1xf32, #tpu.memory_space<smem>>
    %23 = vector.broadcast %22 : f32 to vector<16x1xf32>
    %24 = arith.addf %21, %23 : vector<16x1xf32>
    %25 = arith.negf %24 : vector<16x1xf32>
    %26 = math.exp %25 : vector<16x1xf32>
    %cst_17 = arith.constant 1.000000e+00 : f32
    %27 = vector.broadcast %cst_17 : f32 to vector<16x1xf32>
    %28 = arith.addf %27, %26 : vector<16x1xf32>
    %29 = arith.divf %27, %28 : vector<16x1xf32>
    %c0_18 = arith.constant 0 : index
    %c0_19 = arith.constant 0 : index
    %30 = vector.load %arg8[%c0_18, %c0_19] : memref<16x1xf32, #tpu.memory_space<vmem>>, vector<16x1xf32>
    tpu.vector_store %arg8[%c0_18, %c0_19], %29 {strides = array<i32>} : memref<16x1xf32, #tpu.memory_space<vmem>>, vector<16x1xf32>,
    return
  }
  func.func @transform_0(%arg0: i32) -> (i32, i32) {
    %c0_i32 = arith.constant 0 : i32
    %c0_i32_0 = arith.constant 0 : i32
    return %arg0, %c0_i32 : i32, i32
  }
  func.func @transform_1(%arg0: i32) -> (i32, i32) {
    %c0_i32 = arith.constant 0 : i32
    %c0_i32_0 = arith.constant 0 : i32
    %c0_i32_1 = arith.constant 0 : i32
    return %c0_i32, %c0_i32_0 : i32, i32
  }
  func.func @transform_2(%arg0: i32) -> (i32, i32) {
    %c0_i32 = arith.constant 0 : i32
    %c0_i32_0 = arith.constant 0 : i32
    %c0_i32_1 = arith.constant 0 : i32
    return %c0_i32, %c0_i32_0 : i32, i32
  }
  func.func @transform_3(%arg0: i32) -> (i32, i32) {
    %c0_i32 = arith.constant 0 : i32
    %c0_i32_0 = arith.constant 0 : i32
    %c0_i32_1 = arith.constant 0 : i32
    return %c0_i32, %c0_i32_0 : i32, i32
  }
  func.func @transform_4(%arg0: i32) -> (i32, i32) {
    %c0_i32 = arith.constant 0 : i32
    %c0_i32_0 = arith.constant 0 : i32
    %c0_i32_1 = arith.constant 0 : i32
    return %c0_i32, %c0_i32_0 : i32, i32
  }
  func.func @transform_5(%arg0: i32) -> (i32, i32) {
    %c0_i32 = arith.constant 0 : i32
    %c0_i32_0 = arith.constant 0 : i32
    %c0_i32_1 = arith.constant 0 : i32
    return %c0_i32, %c0_i32_0 : i32, i32
  }
  func.func @transform_6(%arg0: i32) -> (i32, i32) {
    %c0_i32 = arith.constant 0 : i32
    %c0_i32_0 = arith.constant 0 : i32
    %c0_i32_1 = arith.constant 0 : i32
    return %c0_i32, %c0_i32_0 : i32, i32
  }
  func.func @transform_7(%arg0: i32) -> (i32, i32) {
    %c0_i32 = arith.constant 0 : i32
    %c0_i32_0 = arith.constant 0 : i32
    return %arg0, %c0_i32 : i32, i32
  }
}

</mosaic_0001>

<bundles_post_ra>
// kernel: tpu_custom_call.1
= control target key start
LH: loop header
LB: loop body
LE: loop exit
PB: predicated region body
PF: predicated region fallthrough
CT: control target
= control target key end

     0   :  { %vm643_vm0 = vcmask 130048   ;;  %vm933_vm1 = vcmask 1042432   ;;  %vm929_vm2 = vcmask 179200   ;;  %vm973_vm3 = vcmask 162816   ;;  %s2329_s1 = inlined_call_operand.vmem [shape: bf16[784,150], index: 1, kind: input, shape index: {}]   ;;  %s2330_s0 = inlined_call_operand.vmem [shape: f32[16,784], index: 0, kind: input, shape index: {}]   ;;  %s2331_s4 = inlined_call_operand.vmem [shape: f32[1,20], index: 4, kind: input, shape index: {}]   ;;  %s2332_s3 = inlined_call_operand.vmem [shape: bf16[150,20], index: 3, kind: input, shape index: {}]   ;;  %s2333_s2 = inlined_call_operand.vmem [shape: f32[1,150], index: 2, kind: input, shape index: {}]   ;;  %s2334_s5 = inlined_call_operand.vmem [shape: f32[1,20], index: 5, kind: input, shape index: {}]   ;;  %s2335_s6 = inlined_call_operand.<no memory space> [shape: f32[1,1], index: 6, kind: input, shape index: {}]   ;;  %s2336_s7 = inlined_call_operand.vmem [shape: f32[16,1], index: 7, kind: output, shape index: {}]  }
   0x1   :  { %v1087_v0 = vld [vmem:[%s2329_s1 + $0x70] sm:$0xf]  ;;  %v1477_v1 = vld [vmem:[%s2329_s1 + $0x74] sm:$0xf0]  ;;  %v1079_v11 = vld [vmem:[%s2329_s1 + $0x60] sm:$0xf] }
   0x2   :  { %v1215_v2 = vld [vmem:[%s2329_s1 + $0x170] sm:$0xf]  ;;  %v1088_v3 = vor.u32 %v1477_v1, %v1087_v0  ;;  %v1509_v4 = vld [vmem:[%s2329_s1 + $0x174] sm:$0xf0]  ;;  %v1475_v13 = vld [vmem:[%s2329_s1 + $0x64] sm:$0xf0] }
   0x3   :  { %v1279_v5 = vld [vmem:[%s2329_s1 + $0x1f0] sm:$0xf]  ;;  %v1525_v6 = vld [vmem:[%s2329_s1 + $0x1f4] sm:$0xf0]  ;;  %v1216_v7 = vor.u32 %v1509_v4, %v1215_v2  ;;  %v1207_v14 = vld [vmem:[%s2329_s1 + $0x160] sm:$0xf]  ;;  %v1080_v16 = vor.u32 %v1475_v13, %v1079_v11 }
   0x4   :  { %v1280_v8 = vor.u32 %v1525_v6, %v1279_v5  ;;  %v1151_v9 = vld [vmem:[%s2329_s1 + $0xf0] sm:$0xf]  ;;  %v1493_v10 = vld [vmem:[%s2329_s1 + $0xf4] sm:$0xf0]  ;;  %647 = vmatpush.bf16.msra.mxu0 %v1088_v3  ;;  %v1507_v15 = vld [vmem:[%s2329_s1 + $0x164] sm:$0xf0] }
   0x5   :  { %v1152_v12 = vor.u32 %v1493_v10, %v1151_v9  ;;  %675 = vmatpush.bf16.msra.mxu2 %v1216_v7  ;;  %v1208_v17 = vor.u32 %v1507_v15, %v1207_v14  ;;  %v1271_v18 = vld [vmem:[%s2329_s1 + $0x1e0] sm:$0xf]  ;;  %v1523_v19 = vld [vmem:[%s2329_s1 + $0x1e4] sm:$0xf0]  ;;  %v1071_v23 = vld [vmem:[%s2329_s1 + $0x50] sm:$0xf] }
   0x6   :  { %689 = vmatpush.bf16.msra.mxu3 %v1280_v8  ;;  %v1143_v20 = vld [vmem:[%s2329_s1 + $0xe0] sm:$0xf]  ;;  %v1272_v21 = vor.u32 %v1523_v19, %v1271_v18  ;;  %v1491_v22 = vld [vmem:[%s2329_s1 + $0xe4] sm:$0xf0]  ;;  %v1473_v24 = vld [vmem:[%s2329_s1 + $0x54] sm:$0xf0] }
   0x7   :  { %661 = vmatpush.bf16.msra.mxu1 %v1152_v12  ;;  %v1144_v25 = vor.u32 %v1491_v22, %v1143_v20  ;;  %v1199_v26 = vld [vmem:[%s2329_s1 + $0x150] sm:$0xf]  ;;  %v1505_v27 = vld [vmem:[%s2329_s1 + $0x154] sm:$0xf0]  ;;  %v1072_v29 = vor.u32 %v1473_v24, %v1071_v23  ;;  %v1063_v35 = vld [vmem:[%s2329_s1 + $0x40] sm:$0xf] }
   0x8   :  { %v1263_v28 = vld [vmem:[%s2329_s1 + $0x1d0] sm:$0xf]  ;;  %648 = vmatpush.bf16.msra.mxu0 %v1080_v16  ;;  %v1521_v30 = vld [vmem:[%s2329_s1 + $0x1d4] sm:$0xf0]  ;;  %v1200_v33 = vor.u32 %v1505_v27, %v1199_v26  ;;  %v1471_v36 = vld [vmem:[%s2329_s1 + $0x44] sm:$0xf0] }
   0x9   :  { %v1135_v31 = vld [vmem:[%s2329_s1 + $0xd0] sm:$0xf]  ;;  %v1489_v32 = vld [vmem:[%s2329_s1 + $0xd4] sm:$0xf0]  ;;  %676 = vmatpush.bf16.msra.mxu2 %v1208_v17  ;;  %v1264_v34 = vor.u32 %v1521_v30, %v1263_v28  ;;  %v1191_v37 = vld [vmem:[%s2329_s1 + $0x140] sm:$0xf]  ;;  %v1064_v44 = vor.u32 %v1471_v36, %v1063_v35 }
   0xa   :  { %690 = vmatpush.bf16.msra.mxu3 %v1272_v21  ;;  %v1136_v38 = vor.u32 %v1489_v32, %v1135_v31  ;;  %v1503_v39 = vld [vmem:[%s2329_s1 + $0x144] sm:$0xf0]  ;;  %v1255_v40 = vld [vmem:[%s2329_s1 + $0x1c0] sm:$0xf]  ;;  %v1055_v47 = vld [vmem:[%s2329_s1 + $0x30] sm:$0xf] }
   0xb   :  { %662 = vmatpush.bf16.msra.mxu1 %v1144_v25  ;;  %v1519_v41 = vld [vmem:[%s2329_s1 + $0x1c4] sm:$0xf0]  ;;  %v1127_v42 = vld [vmem:[%s2329_s1 + $0xc0] sm:$0xf]  ;;  %v1192_v45 = vor.u32 %v1503_v39, %v1191_v37  ;;  %v1469_v48 = vld [vmem:[%s2329_s1 + $0x34] sm:$0xf0] }
   0xc   :  { %v1487_v43 = vld [vmem:[%s2329_s1 + $0xc4] sm:$0xf0]  ;;  %649 = vmatpush.bf16.msra.mxu0 %v1072_v29  ;;  %v1256_v46 = vor.u32 %v1519_v41, %v1255_v40  ;;  %v1183_v49 = vld [vmem:[%s2329_s1 + $0x130] sm:$0xf]  ;;  %v1501_v51 = vld [vmem:[%s2329_s1 + $0x134] sm:$0xf0]  ;;  %v1056_v56 = vor.u32 %v1469_v48, %v1055_v47 }
   0xd   :  { %677 = vmatpush.bf16.msra.mxu2 %v1200_v33  ;;  %v1128_v50 = vor.u32 %v1487_v43, %v1127_v42  ;;  %v1247_v52 = vld [vmem:[%s2329_s1 + $0x1b0] sm:$0xf]  ;;  %v1517_v53 = vld [vmem:[%s2329_s1 + $0x1b4] sm:$0xf0]  ;;  %v1184_v57 = vor.u32 %v1501_v51, %v1183_v49  ;;  %v1047_v59 = vld [vmem:[%s2329_s1 + $0x20] sm:$0xf] }
   0xe   :  { %691 = vmatpush.bf16.msra.mxu3 %v1264_v34  ;;  %v1119_v54 = vld [vmem:[%s2329_s1 + $0xb0] sm:$0xf]  ;;  %v1485_v55 = vld [vmem:[%s2329_s1 + $0xb4] sm:$0xf0]  ;;  %v1248_v58 = vor.u32 %v1517_v53, %v1247_v52  ;;  %v1467_v60 = vld [vmem:[%s2329_s1 + $0x24] sm:$0xf0] }
   0xf   :  { %663 = vmatpush.bf16.msra.mxu1 %v1136_v38  ;;  %v1175_v61 = vld [vmem:[%s2329_s1 + $0x120] sm:$0xf]  ;;  %v1120_v62 = vor.u32 %v1485_v55, %v1119_v54  ;;  %v1499_v63 = vld [vmem:[%s2329_s1 + $0x124] sm:$0xf0]  ;;  %v1048_v4 = vor.u32 %v1467_v60, %v1047_v59  ;;  %v1039_v5 = vld [vmem:[%s2329_s1 + $0x10] sm:$0xf] }
  0x10   :  { %650 = vmatpush.bf16.msra.mxu0 %v1064_v44  ;;  %v1239_v0 = vld [vmem:[%s2329_s1 + $0x1a0] sm:$0xf]  ;;  %v1515_v1 = vld [vmem:[%s2329_s1 + $0x1a4] sm:$0xf0]  ;;  %v1176_v6 = vor.u32 %v1499_v63, %v1175_v61  ;;  %v1465_v8 = vld [vmem:[%s2329_s1 + $0x14] sm:$0xf0] }
  0x11   :  { %678 = vmatpush.bf16.msra.mxu2 %v1192_v45  ;;  %v1111_v2 = vld [vmem:[%s2329_s1 + $0xa0] sm:$0xf]  ;;  %v1483_v3 = vld [vmem:[%s2329_s1 + $0xa4] sm:$0xf0]  ;;  %v1240_v7 = vor.u32 %v1515_v1, %v1239_v0  ;;  %v1167_v9 = vld [vmem:[%s2329_s1 + $0x110] sm:$0xf]  ;;  %v1040_v18 = vor.u32 %v1465_v8, %v1039_v5 }
  0x12   :  { %692 = vmatpush.bf16.msra.mxu3 %v1256_v46  ;;  %v1497_v10 = vld [vmem:[%s2329_s1 + $0x114] sm:$0xf0]  ;;  %v1112_v11 = vor.u32 %v1483_v3, %v1111_v2  ;;  %v1231_v12 = vld [vmem:[%s2329_s1 + $0x190] sm:$0xf]  ;;  %v1031_v16 = vld [vmem:[%s2329_s1] sm:$0xf] }
  0x13   :  { %664 = vmatpush.bf16.msra.mxu1 %v1128_v50  ;;  %v1513_v13 = vld [vmem:[%s2329_s1 + $0x194] sm:$0xf0]  ;;  %v1103_v14 = vld [vmem:[%s2329_s1 + $0x90] sm:$0xf]  ;;  %v1463_v17 = vld [vmem:[%s2329_s1 + $0x4] sm:$0xf0]  ;;  %v1168_v23 = vor.u32 %v1497_v10, %v1167_v9 }
  0x14   :  { %651 = vmatpush.bf16.msra.mxu0 %v1056_v56  ;;  %v1481_v15 = vld [vmem:[%s2329_s1 + $0x94] sm:$0xf0]  ;;  %v1159_v19 = vld [vmem:[%s2329_s1 + $0x100] sm:$0xf]  ;;  %v1495_v20 = vld [vmem:[%s2329_s1 + $0x104] sm:$0xf0]  ;;  %v1232_v24 = vor.u32 %v1513_v13, %v1231_v12  ;;  %v1032_v35 = vor.u32 %v1463_v17, %v1031_v16 }
  0x15   :  { %679 = vmatpush.bf16.msra.mxu2 %v1184_v57  ;;  %v1223_v21 = vld [vmem:[%s2329_s1 + $0x180] sm:$0xf]  ;;  %v1511_v22 = vld [vmem:[%s2329_s1 + $0x184] sm:$0xf0]  ;;  %v1343_v25 = vld [vmem:[%s2329_s1 + $0x270] sm:$0xf]  ;;  %v1104_v28 = vor.u32 %v1481_v15, %v1103_v14  ;;  %v1160_v39 = vor.u32 %v1495_v20, %v1159_v19 }
  0x16   :  { %693 = vmatpush.bf16.msra.mxu3 %v1248_v58  ;;  %v1541_v26 = vld [vmem:[%s2329_s1 + $0x274] sm:$0xf0]  ;;  %v1476_v27 = vld [vmem:[%s2329_s1 + $0x74] sm:$0xf]  ;;  %v1089_v29 = vld [vmem:[%s2329_s1 + $0x78] sm:$0xf0]  ;;  %v1224_v40 = vor.u32 %v1511_v22, %v1223_v21 }
  0x17   :  { %665 = vmatpush.bf16.msra.mxu1 %v1120_v62  ;;  %v1095_v30 = vld [vmem:[%s2329_s1 + $0x80] sm:$0xf]  ;;  %v1479_v31 = vld [vmem:[%s2329_s1 + $0x84] sm:$0xf0]  ;;  %v30_v32 = vld [vmem:[%s2330_s0 + $0x10] sm:$0xff]  ;;  %v1344_v44 = vor.u32 %v1541_v26, %v1343_v25  ;;  %v1092_v45 = vor.u32 %v1476_v27, %v1089_v29  ;;  %vm1022_vm6 = vcmask 7168  }
  0x18   :  { %652 = vmatpush.bf16.msra.mxu0 %v1048_v4  ;;  %v37_v33 = vld [vmem:[%s2330_s0 + $0x48] sm:$0xff]  ;;  %v1407_v34 = vld [vmem:[%s2329_s1 + $0x2f0] sm:$0xf]  ;;  %v1557_v36 = vld [vmem:[%s2329_s1 + $0x2f4] sm:$0xf0]  ;;  %v1096_v49 = vor.u32 %v1479_v31, %v1095_v30 }
  0x19   :  { %680 = vmatpush.bf16.msra.mxu2 %v1176_v6  ;;  %v1415_v37 = vld [vmem:[%s2329_s1 + $0x300] sm:$0xf]  ;;  %v1559_v38 = vld [vmem:[%s2329_s1 + $0x304] sm:$0xf0]  ;;  %v1492_v41 = vld [vmem:[%s2329_s1 + $0xf4] sm:$0xf]  ;;  %v1868_v54 = vpack.c.bf16 %v37_v33, %v30_v32  ;;  %v1408_v55 = vor.u32 %v1557_v36, %v1407_v34 }
  0x1a   :  { %694 = vmatpush.bf16.msra.mxu3 %v1240_v7  ;;  %v1153_v42 = vld [vmem:[%s2329_s1 + $0xf8] sm:$0xf0]  ;;  %v28_v43 = vld [vmem:[%s2330_s0] sm:$0xff]  ;;  %v38_v48 = vld [vmem:[%s2330_s0 + $0x50] sm:$0xff]  ;;  %v1416_v50 = vor.u32 %v1559_v38, %v1415_v37 }
  0x1b   :  { %666 = vmatpush.bf16.msra.mxu1 %v1112_v11  ;;  %v35_v46 = vld [vmem:[%s2330_s0 + $0x38] sm:$0xff]  ;;  %v1335_v51 = vld [vmem:[%s2329_s1 + $0x260] sm:$0xf]  ;;  %v1539_v52 = vld [vmem:[%s2329_s1 + $0x264] sm:$0xf0]  ;;  %v1156_v59 = vor.u32 %v1492_v41, %v1153_v42 }
  0x1c   :  { %653 = vmatpush.bf16.msra.mxu0 %v1040_v18  ;;  %v31_v47 = vld [vmem:[%s2330_s0 + $0x18] sm:$0xff]  ;;  %v1474_v53 = vld [vmem:[%s2329_s1 + $0x64] sm:$0xf]  ;;  %v1081_v56 = vld [vmem:[%s2329_s1 + $0x68] sm:$0xf0]  ;;  %v1879_v60 = vpack.c.bf16 %v35_v46, %v28_v43  ;;  %v1336_v0 = vor.u32 %v1539_v52, %v1335_v51 }
  0x1d   :  { %681 = vmatpush.bf16.msra.mxu2 %v1168_v23  ;;  %v29_v57 = vld [vmem:[%s2330_s0 + $0x8] sm:$0xff]  ;;  %v36_v58 = vld [vmem:[%s2330_s0 + $0x40] sm:$0xff]  ;;  %v1887_v63 = vpack.c.bf16 %v38_v48, %v31_v47  ;;  %v1084_v3 = vor.u32 %v1474_v53, %v1081_v56  ;;  %v1327_v5 = vld [vmem:[%s2329_s1 + $0x250] sm:$0xf] }
  0x1e   :  { %695 = vmatpush.bf16.msra.mxu3 %v1232_v24  ;;  %v1399_v61 = vld [vmem:[%s2329_s1 + $0x2e0] sm:$0xf]  ;;  %v1555_v62 = vld [vmem:[%s2329_s1 + $0x2e4] sm:$0xf0]  ;;  %v1490_v1 = vld [vmem:[%s2329_s1 + $0xe4] sm:$0xf]  ;;  %v1895_v4 = vpack.c.bf16 %v36_v58, %v29_v57 }
  0x1f   :  { %667 = vmatpush.bf16.msra.mxu1 %v1104_v28  ;;  %v1145_v2 = vld [vmem:[%s2329_s1 + $0xe8] sm:$0xf0]  ;;  %v1537_v6 = vld [vmem:[%s2329_s1 + $0x254] sm:$0xf0]  ;;  %v1400_v7 = vor.u32 %v1555_v62, %v1399_v61  ;;  %v1472_v8 = vld [vmem:[%s2329_s1 + $0x54] sm:$0xf] }
  0x20   :  { %654 = vmatpush.bf16.msra.mxu0 %v1032_v35  ;;  %v1073_v9 = vld [vmem:[%s2329_s1 + $0x58] sm:$0xf0]  ;;  %v1148_v10 = vor.u32 %v1490_v1, %v1145_v2  ;;  %v1391_v11 = vld [vmem:[%s2329_s1 + $0x2d0] sm:$0xf]  ;;  %v1553_v12 = vld [vmem:[%s2329_s1 + $0x2d4] sm:$0xf0]  ;;  %v1328_v13 = vor.u32 %v1537_v6, %v1327_v5 }
  0x21   :  { %682 = vmatpush.bf16.msra.mxu2 %v1160_v39  ;;  %v1488_v14 = vld [vmem:[%s2329_s1 + $0xd4] sm:$0xf]  ;;  %v1137_v15 = vld [vmem:[%s2329_s1 + $0xd8] sm:$0xf0]  ;;  %v1076_v16 = vor.u32 %v1472_v8, %v1073_v9  ;;  %v1319_v17 = vld [vmem:[%s2329_s1 + $0x240] sm:$0xf]  ;;  %v1392_v19 = vor.u32 %v1553_v12, %v1391_v11 }
  0x22   :  { %696 = vmatpush.bf16.msra.mxu3 %v1224_v40  ;;  %v1535_v18 = vld [vmem:[%s2329_s1 + $0x244] sm:$0xf0]  ;;  %v1470_v20 = vld [vmem:[%s2329_s1 + $0x44] sm:$0xf]  ;;  %v1065_v21 = vld [vmem:[%s2329_s1 + $0x48] sm:$0xf0]  ;;  %v1140_v22 = vor.u32 %v1488_v14, %v1137_v15 }
  0x23   :  { %668 = vmatpush.bf16.msra.mxu1 %v1096_v49  ;;  %655 = vmatmul.bf16.vlgmr.msra.gmra.mxu0 %v1879_v60  ;;  %v1383_v23 = vld [vmem:[%s2329_s1 + $0x2c0] sm:$0xf]  ;;  %v1551_v24 = vld [vmem:[%s2329_s1 + $0x2c4] sm:$0xf0]  ;;  %v1320_v25 = vor.u32 %v1535_v18, %v1319_v17  ;;  %v1486_v26 = vld [vmem:[%s2329_s1 + $0xc4] sm:$0xf]  ;;  %v1068_v28 = vor.u32 %v1470_v20, %v1065_v21 }
  0x24   :  { %703 = vmatpush.bf16.msrb.mxu0 %v1344_v44  ;;  %683 = vmatmul.bf16.vlgmr.msra.gmra.mxu2 %v1868_v54  ;;  %v1129_v27 = vld [vmem:[%s2329_s1 + $0xc8] sm:$0xf0]  ;;  %v1311_v29 = vld [vmem:[%s2329_s1 + $0x230] sm:$0xf]  ;;  %v1533_v30 = vld [vmem:[%s2329_s1 + $0x234] sm:$0xf0]  ;;  %v1384_v31 = vor.u32 %v1551_v24, %v1383_v23 }
  0x25   :  { %738 = vmatpush.bf16.msrb.mxu2 %v1416_v50  ;;  %697 = vmatmul.bf16.vlgmr.msra.gmra.mxu3 %v1887_v63  ;;  %v1468_v32 = vld [vmem:[%s2329_s1 + $0x34] sm:$0xf]  ;;  %v1057_v33 = vld [vmem:[%s2329_s1 + $0x38] sm:$0xf0]  ;;  %v1375_v34 = vld [vmem:[%s2329_s1 + $0x2b0] sm:$0xf]  ;;  %v1132_v35 = vor.u32 %v1486_v26, %v1129_v27  ;;  %v1312_v39 = vor.u32 %v1533_v30, %v1311_v29 }
  0x26   :  { %745 = vmatpush.bf16.msrb.mxu3 %v1092_v45  ;;  %669 = vmatmul.bf16.vlgmr.msra.gmra.mxu1 %v1895_v4  ;;  %v1549_v36 = vld [vmem:[%s2329_s1 + $0x2b4] sm:$0xf0]  ;;  %v34_v37 = vld [vmem:[%s2330_s0 + $0x30] sm:$0xff]  ;;  %v41_v38 = vld [vmem:[%s2330_s0 + $0x68] sm:$0xff]  ;;  %v1060_v42 = vor.u32 %v1468_v32, %v1057_v33 }
  0x27   :  { %717 = vmatpush.bf16.msrb.mxu1 %v1408_v55  ;;  %v1484_v40 = vld [vmem:[%s2329_s1 + $0xb4] sm:$0xf]  ;;  %v1121_v41 = vld [vmem:[%s2329_s1 + $0xb8] sm:$0xf0]  ;;  %v1303_v43 = vld [vmem:[%s2329_s1 + $0x220] sm:$0xf]  ;;  %v1376_v45 = vor.u32 %v1549_v36, %v1375_v34  ;;  %v1991_v48 = vpack.c.bf16 %v41_v38, %v34_v37 }
  0x28   :  { %704 = vmatpush.bf16.msrb.mxu0 %v1336_v0  ;;  %v1531_v44 = vld [vmem:[%s2329_s1 + $0x224] sm:$0xf0]  ;;  %v1466_v46 = vld [vmem:[%s2329_s1 + $0x24] sm:$0xf]  ;;  %v1049_v47 = vld [vmem:[%s2329_s1 + $0x28] sm:$0xf0]  ;;  %v1124_v49 = vor.u32 %v1484_v40, %v1121_v41 }
  0x29   :  { %759 = vmatpush.bf16.msra.mxu2 %v1156_v59  ;;  %v1367_v50 = vld [vmem:[%s2329_s1 + $0x2a0] sm:$0xf]  ;;  %v1547_v51 = vld [vmem:[%s2329_s1 + $0x2a4] sm:$0xf0]  ;;  %v1304_v52 = vor.u32 %v1531_v44, %v1303_v43  ;;  %v1482_v53 = vld [vmem:[%s2329_s1 + $0xa4] sm:$0xf]  ;;  %v1052_v56 = vor.u32 %v1466_v46, %v1049_v47 }
  0x2a   :  { %746 = vmatpush.bf16.msrb.mxu3 %v1084_v3  ;;  %v1113_v55 = vld [vmem:[%s2329_s1 + $0xa8] sm:$0xf0]  ;;  %v1295_v57 = vld [vmem:[%s2329_s1 + $0x210] sm:$0xf]  ;;  %v1529_v58 = vld [vmem:[%s2329_s1 + $0x214] sm:$0xf0]  ;;  %v1368_v61 = vor.u32 %v1547_v51, %v1367_v50 }
  0x2b   :  { %718 = vmatpush.bf16.msrb.mxu1 %v1400_v7  ;;  %v1464_v59 = vld [vmem:[%s2329_s1 + $0x14] sm:$0xf]  ;;  %v1041_v62 = vld [vmem:[%s2329_s1 + $0x18] sm:$0xf0]  ;;  %v1359_v0 = vld [vmem:[%s2329_s1 + $0x290] sm:$0xf]  ;;  %v1116_v2 = vor.u32 %v1482_v53, %v1113_v55  ;;  %v1296_v7 = vor.u32 %v1529_v58, %v1295_v57 }
  0x2c   :  { %705 = vmatpush.bf16.msrb.mxu0 %v1328_v13  ;;  %v1545_v1 = vld [vmem:[%s2329_s1 + $0x294] sm:$0xf0]  ;;  %v1480_v3 = vld [vmem:[%s2329_s1 + $0x94] sm:$0xf]  ;;  %v1105_v5 = vld [vmem:[%s2329_s1 + $0x98] sm:$0xf0]  ;;  %v1044_v11 = vor.u32 %v1464_v59, %v1041_v62 }
  0x2d   :  { %760 = vmatpush.bf16.msra.mxu2 %v1148_v10  ;;  %v1287_v6 = vld [vmem:[%s2329_s1 + $0x200] sm:$0xf]  ;;  %v1527_v8 = vld [vmem:[%s2329_s1 + $0x204] sm:$0xf0]  ;;  %v1462_v9 = vld [vmem:[%s2329_s1 + $0x4] sm:$0xf]  ;;  %v1360_v15 = vor.u32 %v1545_v1, %v1359_v0 }
  0x2e   :  { %747 = vmatpush.bf16.msrb.mxu3 %v1076_v16  ;;  %v1033_v10 = vld [vmem:[%s2329_s1 + $0x8] sm:$0xf0]  ;;  %v1508_v12 = vld [vmem:[%s2329_s1 + $0x174] sm:$0xf]  ;;  %v1217_v13 = vld [vmem:[%s2329_s1 + $0x178] sm:$0xf0]  ;;  %v1288_v23 = vor.u32 %v1527_v8, %v1287_v6 }
  0x2f   :  { %719 = vmatpush.bf16.msrb.mxu1 %v1392_v19  ;;  %v1540_v14 = vld [vmem:[%s2329_s1 + $0x274] sm:$0xf]  ;;  %v1345_v16 = vld [vmem:[%s2329_s1 + $0x278] sm:$0xf0]  ;;  %v1351_v17 = vld [vmem:[%s2329_s1 + $0x280] sm:$0xf]  ;;  %v1108_v19 = vor.u32 %v1480_v3, %v1105_v5  ;;  %v1036_v27 = vor.u32 %v1462_v9, %v1033_v10 }
  0x30   :  { %706 = vmatpush.bf16.msrb.mxu0 %v1320_v25  ;;  %v1543_v18 = vld [vmem:[%s2329_s1 + $0x284] sm:$0xf0]  ;;  %v32_v20 = vld [vmem:[%s2330_s0 + $0x20] sm:$0xff]  ;;  %v39_v21 = vld [vmem:[%s2330_s0 + $0x58] sm:$0xff]  ;;  %v1348_v32 = vor.u32 %v1540_v14, %v1345_v16 }
  0x31   :  { %761 = vmatpush.bf16.msra.mxu2 %v1140_v22  ;;  %v1478_v22 = vld [vmem:[%s2329_s1 + $0x84] sm:$0xf]  ;;  %v1097_v24 = vld [vmem:[%s2329_s1 + $0x88] sm:$0xf0]  ;;  %v1524_v25 = vld [vmem:[%s2329_s1 + $0x1f4] sm:$0xf]  ;;  %v1352_v33 = vor.u32 %v1543_v18, %v1351_v17  ;;  %v2097_v37 = vpack.c.bf16 %v39_v21, %v32_v20 }
  0x32   :  { %748 = vmatpush.bf16.msrb.mxu3 %v1068_v28  ;;  %v1281_v26 = vld [vmem:[%s2329_s1 + $0x1f8] sm:$0xf0]  ;;  %v1220_v28 = vor.u32 %v1508_v12, %v1217_v13  ;;  %v1556_v29 = vld [vmem:[%s2329_s1 + $0x2f4] sm:$0xf]  ;;  %v40_v34 = vld [vmem:[%s2330_s0 + $0x60] sm:$0xff]  ;;  %v1100_v38 = vor.u32 %v1478_v22, %v1097_v24 }
  0x33   :  { %720 = vmatpush.bf16.msrb.mxu1 %v1384_v31  ;;  %v1409_v30 = vld [vmem:[%s2329_s1 + $0x2f8] sm:$0xf0]  ;;  %v33_v31 = vld [vmem:[%s2330_s0 + $0x28] sm:$0xff]  ;;  %v1284_v41 = vor.u32 %v1524_v25, %v1281_v26  ;;  %v1522_v43 = vld [vmem:[%s2329_s1 + $0x1e4] sm:$0xf] }
  0x34   :  { %707 = vmatpush.bf16.msrb.mxu0 %v1312_v39  ;;  %1421 = vmatmul.msk.bf16.vlgmr.msrb.gmra.mxu2 %vm643_vm0, %v1991_v48  ;;  %v1209_v36 = vld [vmem:[%s2329_s1 + $0x168] sm:$0xf0]  ;;  %v1538_v39 = vld [vmem:[%s2329_s1 + $0x264] sm:$0xf]  ;;  %v2108_v44 = vpack.c.bf16 %v40_v34, %v33_v31  ;;  %v1504_v51 = vld [vmem:[%s2329_s1 + $0x154] sm:$0xf] }
  0x35   :  { %762 = vmatpush.bf16.msra.mxu2 %v1132_v35  ;;  %v1506_v35 = vld [vmem:[%s2329_s1 + $0x164] sm:$0xf]  ;;  %v1337_v40 = vld [vmem:[%s2329_s1 + $0x268] sm:$0xf0]  ;;  %v1536_v53 = vld [vmem:[%s2329_s1 + $0x254] sm:$0xf] }
  0x36   :  { %749 = vmatpush.bf16.msrb.mxu3 %v1060_v42  ;;  %v1412_v42 = vor.u32 %v1556_v29, %v1409_v30  ;;  %v1273_v46 = vld [vmem:[%s2329_s1 + $0x1e8] sm:$0xf0]  ;;  %v1554_v47 = vld [vmem:[%s2329_s1 + $0x2e4] sm:$0xf]  ;;  %v1340_v50 = vor.u32 %v1538_v39, %v1337_v40  ;;  %v1329_v55 = vld [vmem:[%s2329_s1 + $0x258] sm:$0xf0] }
  0x37   :  { %721 = vmatpush.bf16.msrb.mxu1 %v1376_v45  ;;  %v1212_v45 = vor.u32 %v1506_v35, %v1209_v36  ;;  %v1520_v58 = vld [vmem:[%s2329_s1 + $0x1d4] sm:$0xf]  ;;  %v1393_v0 = vld [vmem:[%s2329_s1 + $0x2d8] sm:$0xf0]  ;;  %v1332_v1 = vor.u32 %v1536_v53, %v1329_v55  ;;  %v1193_v3 = vld [vmem:[%s2329_s1 + $0x148] sm:$0xf0] }
  0x38   :  { %708 = vmatpush.bf16.msrb.mxu0 %v1304_v52  ;;  %v1201_v52 = vld [vmem:[%s2329_s1 + $0x158] sm:$0xf0]  ;;  %v1552_v62 = vld [vmem:[%s2329_s1 + $0x2d4] sm:$0xf]  ;;  %v1534_v5 = vld [vmem:[%s2329_s1 + $0x244] sm:$0xf] }
  0x39   :  { %763 = vmatpush.bf16.msra.mxu2 %v1124_v49  ;;  %v1401_v49 = vld [vmem:[%s2329_s1 + $0x2e8] sm:$0xf0]  ;;  %v1204_v59 = vor.u32 %v1504_v51, %v1201_v52  ;;  %v1396_v8 = vor.u32 %v1552_v62, %v1393_v0  ;;  %v1518_v9 = vld [vmem:[%s2329_s1 + $0x1c4] sm:$0xf]  ;;  %v1500_v13 = vld [vmem:[%s2329_s1 + $0x134] sm:$0xf] }
  0x3a   :  { %750 = vmatpush.bf16.msrb.mxu3 %v1052_v56  ;;  %v1276_v56 = vor.u32 %v1522_v43, %v1273_v46  ;;  %v1404_v57 = vor.u32 %v1554_v47, %v1401_v49  ;;  %v1321_v6 = vld [vmem:[%s2329_s1 + $0x248] sm:$0xf0]  ;;  %v1185_v14 = vld [vmem:[%s2329_s1 + $0x138] sm:$0xf0]  ;;  %v1548_v22 = vld [vmem:[%s2329_s1 + $0x2b4] sm:$0xf] }
  0x3b   :  { %722 = vmatpush.bf16.msrb.mxu1 %v1368_v61  ;;  %v1265_v61 = vld [vmem:[%s2329_s1 + $0x1d8] sm:$0xf0]  ;;  %v1257_v10 = vld [vmem:[%s2329_s1 + $0x1c8] sm:$0xf0]  ;;  %v1324_v12 = vor.u32 %v1534_v5, %v1321_v6  ;;  %v1188_v20 = vor.u32 %v1500_v13, %v1185_v14  ;;  %v1498_v25 = vld [vmem:[%s2329_s1 + $0x124] sm:$0xf] }
  0x3c   :  { %709 = vmatpush.bf16.msrb.mxu0 %v1296_v7  ;;  %v1268_v7 = vor.u32 %v1520_v58, %v1265_v61  ;;  %v1313_v16 = vld [vmem:[%s2329_s1 + $0x238] sm:$0xf0]  ;;  %v1260_v17 = vor.u32 %v1518_v9, %v1257_v10  ;;  %v1177_v26 = vld [vmem:[%s2329_s1 + $0x128] sm:$0xf0]  ;;  %v1514_v31 = vld [vmem:[%s2329_s1 + $0x1a4] sm:$0xf] }
  0x3d   :  { %764 = vmatpush.bf16.msra.mxu2 %v1116_v2  ;;  %v1502_v2 = vld [vmem:[%s2329_s1 + $0x144] sm:$0xf]  ;;  %v1249_v21 = vld [vmem:[%s2329_s1 + $0x1b8] sm:$0xf0]  ;;  %v1369_v35 = vld [vmem:[%s2329_s1 + $0x2a8] sm:$0xf0] }
  0x3e   :  { %751 = vmatpush.bf16.msrb.mxu3 %v1044_v11  ;;  %v1550_v11 = vld [vmem:[%s2329_s1 + $0x2c4] sm:$0xf]  ;;  %v1169_v39 = vld [vmem:[%s2329_s1 + $0x118] sm:$0xf0]  ;;  %v1528_v40 = vld [vmem:[%s2329_s1 + $0x214] sm:$0xf] }
  0x3f   :  { %723 = vmatpush.bf16.msrb.mxu1 %v1360_v15  ;;  %v1532_v15 = vld [vmem:[%s2329_s1 + $0x234] sm:$0xf]  ;;  %v1546_v34 = vld [vmem:[%s2329_s1 + $0x2a4] sm:$0xf]  ;;  %v1233_v47 = vld [vmem:[%s2329_s1 + $0x198] sm:$0xf0] }
  0x40   :  { %710 = vmatpush.bf16.msrb.mxu0 %v1288_v23  ;;  %v1377_v23 = vld [vmem:[%s2329_s1 + $0x2b8] sm:$0xf0]  ;;  %v1316_v24 = vor.u32 %v1532_v15, %v1313_v16  ;;  %v1372_v43 = vor.u32 %v1546_v34, %v1369_v35  ;;  %v1544_v49 = vld [vmem:[%s2329_s1 + $0x294] sm:$0xf]  ;;  %v1494_v52 = vld [vmem:[%s2329_s1 + $0x104] sm:$0xf] }
  0x41   :  { %765 = vmatpush.bf16.msra.mxu2 %v1108_v19  ;;  %v1516_v19 = vld [vmem:[%s2329_s1 + $0x1b4] sm:$0xf]  ;;  %v1380_v30 = vor.u32 %v1548_v22, %v1377_v23  ;;  %v1161_v53 = vld [vmem:[%s2329_s1 + $0x108] sm:$0xf0]  ;;  %v1526_v55 = vld [vmem:[%s2329_s1 + $0x204] sm:$0xf] }
  0x42   :  { %752 = vmatpush.bf16.msrb.mxu3 %v1036_v27  ;;  %v1530_v27 = vld [vmem:[%s2329_s1 + $0x224] sm:$0xf]  ;;  %v1252_v29 = vor.u32 %v1516_v19, %v1249_v21  ;;  %v1417_v58 = vld [vmem:[%s2329_s1 + $0x308] sm:$0xf0]  ;;  %v1164_v62 = vor.u32 %v1494_v52, %v1161_v53  ;;  %v1567_v9 = vld [vmem:[%s2332_s3 + $0x38] sm:$0xff] }
  0x43   :  { %724 = vmatpush.bf16.msrb.mxu1 %v1352_v33  ;;  %711 = vmatmul.bf16.vlgmr.msrb.gmra.mxu0 %v2097_v37  ;;  %v1241_v33 = vld [vmem:[%s2329_s1 + $0x1a8] sm:$0xf0]  ;;  %v1510_v0 = vld [vmem:[%s2329_s1 + $0x184] sm:$0xf]  ;;  %v147_v10 = vld [vmem:[%s2333_s2] sm:$0x3] }
  0x44   :  { %773 = vmatpush.bf16.msra.mxu0 %v1220_v28  ;;  %v1305_v28 = vld [vmem:[%s2329_s1 + $0x228] sm:$0xf0]  ;;  %v149_v14 = vperm.slane %v147_v10, 0  ;;  %v150_v53 = vperm.slane %v147_v10, 1 }
  0x45   :  { %766 = vmatpush.bf16.msra.mxu2 %v1100_v38  ;;  %753 = vmatmul.bf16.vlgmr.msrb.gmra.mxu3 %v1879_v60  ;;  %v1385_v60 = vld [vmem:[%s2329_s1 + $0x2c8] sm:$0xf0]  ;;  %v1308_v36 = vor.u32 %v1530_v27, %v1305_v28  ;;  %v1496_v38 = vld [vmem:[%s2329_s1 + $0x114] sm:$0xf] }
  0x46   :  { %801 = vmatpush.bf16.msra.mxu3 %v1348_v32  ;;  %725 = vmatmul.bf16.vlgmr.msrb.gmra.mxu1 %v2108_v44  ;;  %v1388_v18 = vor.u32 %v1550_v11, %v1385_v60  ;;  %v1180_v32 = vor.u32 %v1498_v25, %v1177_v26  ;;  %v1172_v46 = vor.u32 %v1496_v38, %v1169_v39  ;;  %v1353_v5 = vld [vmem:[%s2329_s1 + $0x288] sm:$0xf0] }
  0x47   :  { %787 = vmatpush.bf16.msra.mxu1 %v1284_v41  ;;  %v1297_v41 = vld [vmem:[%s2329_s1 + $0x218] sm:$0xf0] }
  0x48   :  { %774 = vmatpush.bf16.msra.mxu0 %v1212_v45  ;;  %767 = vmatmul.bf16.vlgmr.msra.gmra.mxu2 %v1895_v4  ;;  %v1196_v4 = vor.u32 %v1502_v2, %v1193_v3  ;;  %v1512_v45 = vld [vmem:[%s2329_s1 + $0x194] sm:$0xf]  ;;  %v1300_v51 = vor.u32 %v1528_v40, %v1297_v41  ;;  %v1542_v3 = vld [vmem:[%s2329_s1 + $0x284] sm:$0xf]  ;;  %v867_v41 = vld [vmem:[%s2332_s3 + $0x48] sm:$0x7] }
  0x49   :  { %815 = vmatpush.bf16.msrb.mxu2 %v1412_v42  ;;  %v1244_v42 = vor.u32 %v1514_v31, %v1241_v33 }
  0x4a   :  { %802 = vmatpush.bf16.msra.mxu3 %v1340_v50  ;;  %v1361_v50 = vld [vmem:[%s2329_s1 + $0x298] sm:$0xf0] }
  0x4b   :  { %788 = vmatpush.bf16.msra.mxu1 %v1276_v56  ;;  %v1289_v56 = vld [vmem:[%s2329_s1 + $0x208] sm:$0xf0]  ;;  %v1364_v61 = vor.u32 %v1544_v49, %v1361_v50 }
  0x4c   :  { %775 = vmatpush.bf16.msra.mxu0 %v1204_v59  ;;  %v1236_v59 = vor.u32 %v1512_v45, %v1233_v47  ;;  %v1292_v2 = vor.u32 %v1526_v55, %v1289_v56 }
  0x4d   :  { %816 = vmatpush.bf16.msrb.mxu2 %v1404_v57  ;;  %v1558_v57 = vld [vmem:[%s2329_s1 + $0x304] sm:$0xf] }
  0x4e   :  { %803 = vmatpush.bf16.msra.mxu3 %v1332_v1  ;;  %v1225_v1 = vld [vmem:[%s2329_s1 + $0x188] sm:$0xf0]  ;;  %v1420_v6 = vor.u32 %v1558_v57, %v1417_v58 }
  0x4f   :  { %789 = vmatpush.bf16.msra.mxu1 %v1268_v7  ;;  %v1228_v7 = vor.u32 %v1510_v0, %v1225_v1 }
  0x50   :  { %776 = vmatpush.bf16.msra.mxu0 %v1196_v4  ;;  %v1566_v4 = vld [vmem:[%s2332_s3 + $0x30] sm:$0xff] }
  0x51   :  { %817 = vmatpush.bf16.msrb.mxu2 %v1396_v8  ;;  %v1356_v8 = vor.u32 %v1542_v3, %v1353_v5 }
  0x52   :  { %804 = vmatpush.bf16.msra.mxu3 %v1324_v12  ;;  %v1560_v12 = vld [vmem:[%s2332_s3] sm:$0xff] }
  0x53   :  { %790 = vmatpush.bf16.msra.mxu1 %v1260_v17 }
  0x54   :  { %777 = vmatpush.bf16.msra.mxu0 %v1188_v20 }
  0x55   :  { %818 = vmatpush.bf16.msrb.mxu2 %v1388_v18 }
  0x56   :  { %805 = vmatpush.bf16.msra.mxu3 %v1316_v24 }
  0x57   :  { %791 = vmatpush.bf16.msra.mxu1 %v1252_v29 }
  0x58   :  { %778 = vmatpush.bf16.msra.mxu0 %v1180_v32 }
  0x59   :  { %819 = vmatpush.bf16.msrb.mxu2 %v1380_v30 }
  0x5a   :  { %806 = vmatpush.bf16.msra.mxu3 %v1308_v36 }
  0x5b   :  { %792 = vmatpush.bf16.msra.mxu1 %v1244_v42  ;;  %v909_v42 = vunpack.c.l.b16 %v867_v41 }
  0x5c   :  { %779 = vmatpush.bf16.msra.mxu0 %v1172_v46 }
  0x5d   :  { %820 = vmatpush.bf16.msrb.mxu2 %v1372_v43  ;;  %v919_v46 = vpack.c.b16 %v909_v42, %v909_v42 }
  0x5e   :  { %807 = vmatpush.bf16.msra.mxu3 %v1300_v51  ;;  %v1568_v51 = vld [vmem:[%s2332_s3 + $0x40] sm:$0xff] }
  0x5f   :  { %793 = vmatpush.bf16.msra.mxu1 %v1236_v59  ;;  %v935_v50 = vsel %vm933_vm1, %v919_v46, 0 }
  0x60   :  { %780 = vmatpush.bf16.msra.mxu0 %v1164_v62 }
  0x61   :  { %821 = vmatpush.bf16.msrb.mxu2 %v1364_v61 }
  0x62   :  { %808 = vmatpush.bf16.msra.mxu3 %v1292_v2 }
  0x63   :  { %794 = vmatpush.bf16.msra.mxu1 %v1228_v7  ;;  %781 = vmatmul.bf16.vlgmr.msra.gmra.mxu0 %v1868_v54  ;;  %v1565_v54 = vld [vmem:[%s2332_s3 + $0x28] sm:$0xff] }
  0x64   :  { %836 = vmatpush.bf16.msrb.mxu0 %v1420_v6 }
  0x65   :  { %809 = vmatmul.bf16.vlgmr.msra.gmra.mxu3 %v2097_v37  ;;  %822 = vmatpush.bf16.msrb.mxu2 %v1356_v8  ;;  %v1562_v37 = vld [vmem:[%s2332_s3 + $0x10] sm:$0xff] }
  0x66   :  { %795 = vmatmul.bf16.vlgmr.msra.gmra.mxu1 %v1887_v63  ;;  %v1564_v63 = vld [vmem:[%s2332_s3 + $0x20] sm:$0xff]  ;;  %957 = vmatpush.bf16.msrb.mxu3 %v935_v50 }
  0x67   :  { %937 = vmatpush.bf16.msrb.mxu1 %v1567_v9 }
  0x68   :  { %823 = vmatmul.bf16.vlgmr.msrb.gmra.mxu2 %v2108_v44  ;;  %v1561_v44 = vld [vmem:[%s2332_s3 + $0x8] sm:$0xff] }
  0x6a   :  { %958 = vmatpush.bf16.msrb.mxu3 %v1568_v51 }
  0x6b   :  { %938 = vmatpush.bf16.msrb.mxu1 %v1566_v4 }
  0x6f   :  { %939 = vmatpush.bf16.msrb.mxu1 %v1565_v54 }
  0x73   :  { %1422 = vmatmul.msk.bf16.vlgmr.msrb.gmra.mxu0 %vm643_vm0, %v1991_v48  ;;  %940 = vmatpush.bf16.msrb.mxu1 %v1564_v63  ;;  %v1563_v48 = vld [vmem:[%s2332_s3 + $0x18] sm:$0xff] }
  0x77   :  { %941 = vmatpush.bf16.msrb.mxu1 %v1563_v48 }
  0x7b   :  { %942 = vmatpush.bf16.msrb.mxu1 %v1562_v37 }
  0x7f   :  { %943 = vmatpush.bf16.msrb.mxu1 %v1561_v44 }
  0x83   :  { %944 = vmatpush.bf16.msrb.mxu1 %v1560_v12 }
  0xa0   :  { %v656_v11 = vpop.f32.mrf.mxu0 }
  0xa1   :  { %v657_v15 = vadd.f32 %v656_v11, %v149_v14 }
  0xa3   :  { %v670_v13 = vpop.f32.mrf.mxu1 }
  0xa4   :  { %v671_v18 = vadd.f32 %v670_v13, %v657_v15 }
  0xa7   :  { %v684_v60 = vpop.f32.mrf.mxu2 }
  0xa8   :  { %v658_v16 = vpop.f32.mrf.mxu0  ;;  %v698_v19 = vpop.f32.mrf.mxu3  ;;  %v685_v22 = vadd.f32 %v684_v60, %v671_v18 }
  0xa9   :  { %v659_v21 = vadd.f32 %v658_v16, %v149_v14 }
  0xaa   :  { %v699_v26 = vadd.f32 %v698_v19, %v685_v22 }
  0xab   :  { %v672_v20 = vpop.f32.mrf.mxu1 }
  0xac   :  { %v673_v23 = vadd.f32 %v672_v20, %v659_v21  ;;  %v1570_v21 = vld [vmem:[%s2334_s5] ss:$0 sm:$0xff] }
  0xaf   :  { %v686_v17 = vpop.f32.mrf.mxu2 }
  0xb0   :  { %v687_v28 = vadd.f32 %v686_v17, %v673_v23  ;;  %v700_v30 = vpop.f32.mrf.mxu3  ;;  %v1569_v17 = vld [vmem:[%s2331_s4] ss:$0 sm:$0xff] }
  0xb2   :  { %v701_v31 = vadd.f32 %v700_v30, %v687_v28 }
  0xb7   :  { %v740_v25 = vpop.f32.mrf.mxu2 }
  0xbf   :  { %v742_v36 = vpop.f32.mrf.mxu2 }
  0xc0   :  { %v712_v24 = vpop.f32.mrf.mxu0 }
  0xc1   :  { %v713_v29 = vadd.f32 %v712_v24, %v699_v26 }
  0xc3   :  { %v726_v27 = vpop.f32.mrf.mxu1 }
  0xc4   :  { %v727_v32 = vadd.f32 %v726_v27, %v713_v29 }
  0xc6   :  { %v741_v38 = vadd.f32 %v740_v25, %v727_v32  ;;  %v981_v32 = vstv %s2335_s6 }
  0xc8   :  { %v714_v33 = vpop.f32.mrf.mxu0  ;;  %v843_v43 = vmax.f32 %v741_v38, 0.0  ;;  %v754_v49 = vpop.f32.mrf.mxu3 }
  0xc9   :  { %v715_v34 = vadd.f32 %v714_v33, %v701_v31  ;;  %v755_v58 = vadd.f32 %v754_v49, %v150_v53 }
  0xcb   :  { %v728_v35 = vpop.f32.mrf.mxu1  ;;  %v768_v52 = vpop.f32.mrf.mxu2 }
  0xcc   :  { %v729_v39 = vadd.f32 %v728_v35, %v715_v34  ;;  %v769_v61 = vadd.f32 %v768_v52, %v755_v58 }
  0xce   :  { %v743_v40 = vadd.f32 %v742_v36, %v729_v39 }
  0xd0   :  { %v845_v45 = vmax.f32 %v743_v40, 0.0  ;;  %v756_v55 = vpop.f32.mrf.mxu3 }
  0xd1   :  { %v757_v62 = vadd.f32 %v756_v55, %v150_v53 }
  0xd2   :  { %v847_v47 = vpack.c.bf16 %v845_v45, %v843_v43 }
  0xd3   :  { %v770_v57 = vpop.f32.mrf.mxu2 }
  0xd4   :  { %945 = vmatmul.bf16.vlgmr.msrb.gmra.mxu1 %v847_v47  ;;  %v771_v3 = vadd.f32 %v770_v57, %v757_v62 }
  0xe0   :  { %v782_v56 = vpop.f32.mrf.mxu0 }
  0xe1   :  { %v783_v5 = vadd.f32 %v782_v56, %v769_v61 }
  0xe3   :  { %v796_v59 = vpop.f32.mrf.mxu1 }
  0xe4   :  { %v797_v8 = vadd.f32 %v796_v59, %v783_v5 }
  0xe8   :  { %v810_v0 = vpop.f32.mrf.mxu3  ;;  %v784_v1 = vpop.f32.mrf.mxu0 }
  0xe9   :  { %v785_v6 = vadd.f32 %v784_v1, %v771_v3  ;;  %v811_v54 = vadd.f32 %v810_v0, %v797_v8 }
  0xeb   :  { %v824_v2 = vpop.f32.mrf.mxu2  ;;  %v798_v7 = vpop.f32.mrf.mxu1 }
  0xec   :  { %v799_v63 = vadd.f32 %v798_v7, %v785_v6  ;;  %v825_v44 = vadd.f32 %v824_v2, %v811_v54 }
  0xf0   :  { %v812_v9 = vpop.f32.mrf.mxu3  ;;  %v838_v4 = vpop.f32.mrf.mxu0 }
  0xf1   :  { %v813_v48 = vadd.f32 %v812_v9, %v799_v63  ;;  %v839_v10 = vadd.f32 %v838_v4, %v825_v44 }
  0xf3   :  { %v826_v37 = vpop.f32.mrf.mxu2  ;;  %v844_v13 = vmax.f32 %v839_v10, 0.0 }
  0xf4   :  { %v827_v11 = vadd.f32 %v826_v37, %v813_v48 }
  0xf8   :  { %v840_v60 = vpop.f32.mrf.mxu0 }
  0xf9   :  { %v841_v12 = vadd.f32 %v840_v60, %v827_v11 }
  0xfb   :  { %v846_v14 = vmax.f32 %v841_v12, 0.0 }
  0xfd   :  { %v848_v15 = vpack.c.bf16 %v846_v14, %v844_v13 }
  0xff   :  { %1459 = vmatmul.msk.bf16.vlgmr.msrb.gmra.mxu3 %vm929_vm2, %v848_v15 }
 0x151   :  { %v946_v16 = vpop.f32.mrf.mxu1 }
 0x152   :  { %v947_v18 = vadd.f32 %v1569_v17, %v946_v16 }
 0x159   :  { %v948_v23 = vpop.f32.mrf.mxu1 }
 0x15a   :  { %v949_v25 = vadd.f32 %v1569_v17, %v948_v23 }
 0x182   :  { %v960_v19 = vpop.f32.mrf.mxu3 }
 0x183   :  { %v961_v20 = vadd.f32 %v960_v19, %v947_v18 }
 0x185   :  { %v965_v22 = vmax.f32 %v961_v20, 0.0 }
 0x187   :  { %v971_v24 = vmul.f32 %v1570_v21, %v965_v22 }
 0x189   :  { %v974_v26 = vsel %vm973_vm3, %v971_v24, 0.0 }
 0x18a   :  { %v962_v27 = vpop.f32.mrf.mxu3  ;;  %975 = vadd.xlane.f32.xlu0 %v974_v26 }
 0x18b   :  { %v963_v28 = vadd.f32 %v962_v27, %v949_v25 }
 0x18d   :  { %v966_v29 = vmax.f32 %v963_v28, 0.0 }
 0x18f   :  { %v972_v30 = vmul.f32 %v1570_v21, %v966_v29 }
 0x191   :  { %v977_v31 = vsel %vm973_vm3, %v972_v30, 0.0 }
 0x192   :  { %978 = vadd.xlane.f32.xlu0 %v977_v31 }
 0x1fd   :  { %v976_v33 = vpop.xlane.xlu0 %975 }
 0x1fe   :  { %v982_v34 = vadd.f32 %v981_v32, %v976_v33 }
 0x200   :  { %v1460_v35 = vmul.f32 -1.442695, %v982_v34 }
 0x202   :  { %1571 = vpow2.f32 %v1460_v35 }
 0x205   :  { %v979_v36 = vpop.xlane.xlu0 %978 }
 0x206   :  { %v983_v38 = vadd.f32 %v981_v32, %v979_v36 }
 0x208   :  { %v1572_v39 = vpop.eup %1571  ;;  %v1461_v40 = vmul.f32 -1.442695, %v983_v38 }
 0x209   :  { %v990_v41 = vadd.f32 1.0, %v1572_v39 }
 0x20a   :  { %1573 = vpow2.f32 %v1461_v40 }
 0x20b   :  { %1575 = vrcp.f32 %v990_v41  ;;  %v1003_v49 = vand.u32 2147483648, %v990_v41  ;;  %v1001_v51 = vand.u32 2147483647, %v990_v41  ;;  %vm997_vm5 = vweird.f32 %v990_v41 }
 0x20d   :  { %v1004_v55 = vor.u32 1.1754944e-38, %v1003_v49  ;;  %vm1002_vm8 = vcmp.eq.f32.partialorder %v1001_v51, 8.507059e+37 }
 0x210   :  { %v1574_v42 = vpop.eup %1573 }
 0x211   :  { %v1576_v43 = vpop.eup %1575  ;;  %v991_v45 = vadd.f32 1.0, %v1574_v42 }
 0x212   :  { %v993_v46 = vmul.f32 %v1576_v43, %v990_v41  ;;  %vm998_vm4 = vweird.f32 %v1576_v43 }
 0x213   :  { %1577 = vrcp.f32 %v991_v45  ;;  %vm999_vm7 = vmor %vm997_vm5, %vm998_vm4  ;;  %v1018_v61 = vand.u32 2147483648, %v991_v45  ;;  %v1016_v0 = vand.u32 2147483647, %v991_v45  ;;  %vm1012_vm10 = vweird.f32 %v991_v45 }
 0x214   :  { %v994_v47 = vsub.f32 1.0, %v993_v46 }
 0x215   :  { %v1019_v2 = vor.u32 1.1754944e-38, %v1018_v61  ;;  %vm1017_vm12 = vcmp.eq.f32.partialorder %v1016_v0, 8.507059e+37 }
 0x216   :  { %v995_v50 = vmul.f32 %v1576_v43, %v994_v47 }
 0x218   :  { %v996_v52 = vadd.f32 %v1576_v43, %v995_v50 }
 0x219   :  { %v1578_v53 = vpop.eup %1577 }
 0x21a   :  { %v1000_v56 = vsel %vm999_vm7, %v1576_v43, %v996_v52  ;;  %v1008_v57 = vmul.f32 %v1578_v53, %v991_v45  ;;  %vm1013_vm9 = vweird.f32 %v1578_v53 }
 0x21b   :  { %v1005_v58 = vsel %vm1002_vm8, %v1004_v55, %v1000_v56  ;;  %vm1014_vm11 = vmor %vm1012_vm10, %vm1013_vm9 }
 0x21c   :  { %1023 = vst.msk [vmem:[%s2336_s7] sm:$0xff] %vm1022_vm6, %v1005_v58  ;;  %v1009_v59 = vsub.f32 1.0, %v1008_v57 }
 0x21e   :  { %v1010_v62 = vmul.f32 %v1578_v53, %v1009_v59 }
 0x220   :  { %v1011_v1 = vadd.f32 %v1578_v53, %v1010_v62 }
 0x222   :  { %v1015_v3 = vsel %vm1014_vm11, %v1578_v53, %v1011_v1 }
 0x223   :  { %v1020_v5 = vsel %vm1017_vm12, %v1019_v2, %v1015_v3 }
 0x224   :  { %1024 = vst.msk [vmem:[%s2336_s7 + $0x8] sm:$0xff] %vm1022_vm6, %v1020_v5 }

</bundles_post_ra>
